<compile_context>
chip_gen: v7x
topology: tpu7x:2x2x1
jax: 0.10.0
libtpu: 0.0.40
codegen_flags: <defaults>
</compile_context>

<pallas_src>
import jax
import jax.numpy as jnp
from jax.experimental import pallas as pl
from jax.experimental.pallas import tpu as pltpu


LANE = 128        # feature dims padded to a multiple of the lane width
SUBLANE = 8       # batch tile must be a multiple of the sublane count
DEFAULT_TM = 512  # batch-tile rows (mem-bound roofline ~85% at 512-1024)


def _round_up(x: int, m: int) -> int:
    return (x + m - 1) // m * m


def _cdiv(a: int, b: int) -> int:
    return -(-a // b)


def _device_kind() -> str:
    try:
        return jax.devices()[0].device_kind.lower()
    except Exception:
        return ""


def default_tanh_dtype():
    """bf16 tanh on v6e/v7x (bf16 EUP), f32 elsewhere (v5e has no bf16 EUP)."""
    kind = _device_kind()
    if "v6" in kind or "v7" in kind:
        return jnp.bfloat16
    return jnp.float32


def _vmem_cap_bytes(kind: str) -> int:
    """Generation-aware VMEM ceiling with headroom for Mosaic internals."""
    cap = None
    try:
        cap = int(pltpu.get_tpu_info().vmem_capacity_bytes)
    except Exception:
        cap = None
    if not cap or cap <= 0:
        cap = (64 if "v7" in kind else 128) * (2 ** 20)
    return int(cap * 0.85)   # ~108 MiB on v5e/v6e, ~54 MiB on v7x


def _compiler_params(dim_sem, vmem_limit):
    Params = getattr(pltpu, "CompilerParams", None)
    if Params is None:  # very old naming fallback
        Params = getattr(pltpu, "TPUCompilerParams")
    return Params(dimension_semantics=dim_sem, vmem_limit_bytes=int(vmem_limit))


def _resident_spec(shape, use_buffered):
    """BlockSpec whose block never changes across the grid -> VMEM resident.

    With Buffered(1) Pallas keeps a single copy instead of double-buffering."""
    def const_map(i):
        return (0, 0)
    if use_buffered and hasattr(pl, "Buffered"):
        try:
            return pl.BlockSpec(shape, const_map, pipeline_mode=pl.Buffered(1))
        except TypeError:
            pass
    return pl.BlockSpec(shape, const_map)


def _make_mlp_kernel(n_layers, apply_output_tanh, compute_dtype, tanh_dtype,
                     k0, k0p):
    """Kernel refs: (x, w0, b0, ..., w_{n-1}, b_{n-1}, out[, pad_scratch])."""
    pad_input = (k0 != k0p)
    tanh_is_f32 = jnp.dtype(tanh_dtype) == jnp.dtype(jnp.float32)

    def kernel(*refs):
        x_ref = refs[0]
        if pad_input:
            o_ref, pad_ref = refs[-2], refs[-1]
        else:
            o_ref, pad_ref = refs[-1], None

        if pad_input:
            # Zero the lane-padding columns once (scratch persists over grid).
            @pl.when(pl.program_id(0) == 0)
            def _():
                pad_ref[...] = jnp.zeros_like(pad_ref)
            # Cast f32 -> compute dtype and drop into the lane-aligned scratch.
            pad_ref[:, :k0] = x_ref[...].astype(compute_dtype)
            h = pad_ref[...]
        else:
            h = x_ref[...].astype(compute_dtype)

        for i in range(n_layers):
            w = refs[1 + 2 * i][...]        # VMEM-resident, single-buffered
            b = refs[2 + 2 * i][...]        # f32 [1, Np]
            # bf16 x bf16 -> f32 accumulate on the MXU.
            acc = jnp.dot(h, w, preferred_element_type=jnp.float32) + b
            last = i == n_layers - 1
            if last:
                if apply_output_tanh:
                    acc = jnp.tanh(acc)
                o_ref[...] = acc.astype(o_ref.dtype)   # lane-dense store
            else:
                if tanh_is_f32:
                    h = jnp.tanh(acc).astype(compute_dtype)
                else:
                    # bf16 EUP tanh (v6e/v7x): ~2x tanh throughput, less VMEM.
                    h = jnp.tanh(acc.astype(tanh_dtype)).astype(compute_dtype)

    return kernel


def prepare_mlp_params(params, compute_dtype=jnp.bfloat16):
    """Pad feature dims to 128 lanes and cast weights to compute_dtype ONCE
    (hoisted out of the per-call hot path)."""
    in_dim = params[0][0].shape[0]
    dims = [in_dim] + [w.shape[1] for (w, _) in params]
    dims_p = [_round_up(max(d, LANE), LANE) for d in dims]
    padded = []
    for li, (w, b) in enumerate(params):
        kp, np_ = dims_p[li], dims_p[li + 1]
        w_p = jnp.zeros((kp, np_), compute_dtype)
        w_p = w_p.at[: w.shape[0], : w.shape[1]].set(w.astype(compute_dtype))
        b_p = jnp.zeros((1, np_), jnp.float32)
        b_p = b_p.at[0, : b.shape[0]].set(b.astype(jnp.float32))
        padded.append((w_p, b_p))
    return {"padded": padded, "dims": dims, "dims_p": dims_p,
            "compute_dtype": jnp.dtype(compute_dtype)}


def mlp_forward(x, params_or_prepared, *, output_activation=None,
                output_squeeze=False, block_m=DEFAULT_TM, tanh_dtype=None,
                compute_dtype=jnp.bfloat16):
    """Pallas implementation of MLP.forward.

    x: [batch, in_features] (float32), passed to the kernel un-padded.
    params_or_prepared: either a raw list of (W[in,out], b[out]) or the output
    of prepare_mlp_params (preferred: padding/cast is then done only once).
    """
    if output_activation is None:
        apply_out_tanh = False
    elif output_activation == "tanh" or output_activation is jnp.tanh:
        apply_out_tanh = True
    else:
        # TODO(synk): only tanh (torch default) is fused in-kernel; other
        # callables would need a second elementwise pass.
        raise NotImplementedError(
            f"output_activation={output_activation!r} not supported in-kernel")

    prep = (params_or_prepared if isinstance(params_or_prepared, dict)
            else prepare_mlp_params(params_or_prepared, compute_dtype))
    compute_dtype = prep["compute_dtype"]
    dims, dims_p = prep["dims"], prep["dims_p"]
    n_layers = len(prep["padded"])

    B, K0 = x.shape
    assert K0 == dims[0], f"input feature dim {K0} != params in_dim {dims[0]}"
    out_dim, out_p, k0p = dims[-1], dims_p[-1], dims_p[0]

    if tanh_dtype is None:
        tanh_dtype = default_tanh_dtype()

    kind = _device_kind()
    vmem_cap = _vmem_cap_bytes(kind)
    cbytes = jnp.dtype(compute_dtype).itemsize
    xbytes = jnp.dtype(x.dtype).itemsize
    obytes = jnp.dtype(x.dtype).itemsize

    weight_bytes = sum(dims_p[i] * dims_p[i + 1] for i in range(n_layers)) * cbytes
    bias_bytes = sum(dims_p[1:]) * 4
    # Worst case (no Buffered(1) support) weights are double-buffered.
    fixed_bytes = 2 * (weight_bytes + bias_bytes)
    # TODO(synk): if resident padded weights ever exceed the VMEM cap (huge
    # hidden dims), stream them from HBM (memory_space=pl.ANY + emit_pipeline)
    # instead of failing; not needed for policy-gradient sized MLPs.

    # Adaptive batch tile: minimise padding waste (<= one sublane tile) and
    # shrink if the VMEM budget does not allow the requested block_m.
    block_m_eff = max(SUBLANE, min(block_m, _round_up(B, SUBLANE)))
    while True:
        n_tiles = _cdiv(B, block_m_eff)
        tm = _round_up(_cdiv(B, n_tiles), SUBLANE)
        per_row = (2 * K0 * xbytes                      # x tile (double-buffered)
                   + 2 * out_p * obytes                 # out tile (double-buffered)
                   + (k0p * cbytes if k0p != K0 else 0)  # pad scratch
                   + 3 * max(dims_p) * 4)               # f32 acc + headroom
        vmem_needed = fixed_bytes + tm * per_row
        if vmem_needed <= vmem_cap or block_m_eff <= SUBLANE:
            break
        block_m_eff = max(SUBLANE, block_m_eff // 2)

    grid = (_cdiv(B, tm),)
    vmem_limit = int(min(max(int(1.25 * vmem_needed), 32 * 2 ** 20), vmem_cap))

    rows = grid[0] * tm
    flops = int(2 * rows * sum(dims_p[i] * dims_p[i + 1] for i in range(n_layers)))
    trans = int(rows * sum(dims_p[1:-1]) + (rows * out_p if apply_out_tanh else 0))
    bytes_acc = int(B * K0 * xbytes + weight_bytes + bias_bytes + B * out_p * obytes)

    flat = [a for pair in prep["padded"] for a in pair]

    # v7x: shard the batch grid axis across both TensorCores when possible.
    if "v7" in kind and grid[0] >= 2 and hasattr(pltpu, "CORE_PARALLEL"):
        primary_sem = (pltpu.CORE_PARALLEL,)
    else:
        primary_sem = ("parallel",)

    def run(use_buffered, dim_sem, tanh_dt):
        kernel = _make_mlp_kernel(n_layers, apply_out_tanh, compute_dtype,
                                  tanh_dt, K0, k0p)
        in_specs = [pl.BlockSpec((tm, K0), lambda i: (i, 0))]
        for li in range(n_layers):
            kp, np_ = dims_p[li], dims_p[li + 1]
            in_specs.append(_resident_spec((kp, np_), use_buffered))
            in_specs.append(_resident_spec((1, np_), use_buffered))
        scratch = ([pltpu.VMEM((tm, k0p), compute_dtype)] if k0p != K0 else [])
        return pl.pallas_call(
            kernel,
            out_shape=jax.ShapeDtypeStruct((B, out_p), x.dtype),
            grid=grid,
            in_specs=in_specs,
            out_specs=pl.BlockSpec((tm, out_p), lambda i: (i, 0)),
            scratch_shapes=scratch,
            compiler_params=_compiler_params(dim_sem, vmem_limit),
            cost_estimate=pl.CostEstimate(flops=flops, transcendentals=trans,
                                          bytes_accessed=bytes_acc),
        )(x, *flat)

    # Preferred config first, then progressively more conservative fallbacks
    # (in case the installed Mosaic rejects Buffered(1)/CORE_PARALLEL/bf16 tanh).
    attempts = [(True, primary_sem, tanh_dtype)]
    if primary_sem != ("parallel",):
        attempts.append((True, ("parallel",), tanh_dtype))
    attempts.append((False, ("parallel",), tanh_dtype))
    if jnp.dtype(tanh_dtype) != jnp.dtype(jnp.float32):
        attempts.append((False, ("parallel",), jnp.float32))

    last_err = None
    out = None
    for use_buffered, dim_sem, tanh_dt in attempts:
        try:
            out = run(use_buffered, dim_sem, tanh_dt)
            break
        except Exception as e:  # feature-support fallback
            last_err = e
    if out is None:
        raise last_err

    out = out[:, :out_dim]
    if output_squeeze:
        # Matches torch `x.squeeze()` (drops ALL size-1 dims, incl. batch=1).
        out = jnp.squeeze(out)
    return out


def init_mlp_params(key, layers):
    """nn.Linear-style init (U(-1/sqrt(fan_in), +)) with zero bias."""
    params = []
    for fan_in, fan_out in zip(layers[:-1], layers[1:]):
        key, wk = jax.random.split(key)
        bound = 1.0 / jnp.sqrt(jnp.float32(fan_in))
        w = jax.random.uniform(wk, (fan_in, fan_out), jnp.float32, -bound, bound)
        b = jnp.zeros((fan_out,), jnp.float32)
        params.append((w, b))
    return params


def mlp_reference_mirror(x, params, output_activation=None,
                         compute_dtype=jnp.bfloat16, tanh_dtype=jnp.float32):
    """Pure-JAX reference mirroring the kernel's quantization points."""
    tanh_is_f32 = jnp.dtype(tanh_dtype) == jnp.dtype(jnp.float32)
    h = x.astype(compute_dtype).astype(jnp.float32)
    n = len(params)
    for i, (w, b) in enumerate(params):
        wq = w.astype(compute_dtype).astype(jnp.float32)
        acc = h @ wq + b.astype(jnp.float32)
        if i < n - 1:
            if tanh_is_f32:
                h = jnp.tanh(acc).astype(compute_dtype).astype(jnp.float32)
            else:
                h = (jnp.tanh(acc.astype(tanh_dtype))
                     .astype(compute_dtype).astype(jnp.float32))
        else:
            h = jnp.tanh(acc) if output_activation == "tanh" else acc
    return h


def mlp_reference_f32(x, params, output_activation=None):
    h = x
    n = len(params)
    for i, (w, b) in enumerate(params):
        h = h @ w + b
        if i < n - 1:
            h = jnp.tanh(h)
        elif output_activation == "tanh":
            h = jnp.tanh(h)
    return h


if __name__ == "__main__":
    key = jax.random.PRNGKey(0)
    layers = [4, 32, 32, 2]            # [obs_dim, hidden, hidden, act_dim]
    batch = 8

    key, xk = jax.random.split(key)
    x = jax.random.normal(xk, (batch, layers[0]), jnp.float32)
    params = init_mlp_params(key, layers)

    # Padding / casting hoisted out of the hot path (done once).
    prep = prepare_mlp_params(params)
    tanh_dt = default_tanh_dtype()
    tanh_is_f32 = jnp.dtype(tanh_dt) == jnp.dtype(jnp.float32)
    mirror_atol = 2e-3 if tanh_is_f32 else 3e-2

    # Default path (output_activation=None).
    out = jax.block_until_ready(mlp_forward(x, prep, tanh_dtype=tanh_dt))
    assert out.shape == (batch, layers[-1])
    ref_mirror = mlp_reference_mirror(x, params, None, jnp.bfloat16, tanh_dt)
    assert jnp.allclose(out, ref_mirror, atol=mirror_atol, rtol=mirror_atol), \
        "mismatch vs quantization-mirroring reference"
    ref_f32 = mlp_reference_f32(x, params)
    assert jnp.allclose(out, ref_f32, atol=5e-2, rtol=5e-2), \
        "bf16 compute path diverged too far from f32 reference"

    # tanh output_activation path.
    out_t = jax.block_until_ready(
        mlp_forward(x, prep, output_activation="tanh", tanh_dtype=tanh_dt))
    ref_t = mlp_reference_mirror(x, params, "tanh", jnp.bfloat16, tanh_dt)
    assert jnp.allclose(out_t, ref_t, atol=mirror_atol, rtol=mirror_atol), \
        "mismatch vs reference (tanh output activation)"

    # Awkward batch size: multi-step grid with a partial (masked) last tile,
    # exercising the no-batch-padding path.
    b2 = 260
    key, xk2 = jax.random.split(key)
    x2 = jax.random.normal(xk2, (b2, layers[0]), jnp.float32)
    out2 = jax.block_until_ready(
        mlp_forward(x2, prep, block_m=64, tanh_dtype=tanh_dt))
    assert out2.shape == (b2, layers[-1])
    ref2 = mlp_reference_mirror(x2, params, None, jnp.bfloat16, tanh_dt)
    assert jnp.allclose(out2, ref2, atol=mirror_atol, rtol=mirror_atol), \
        "mismatch vs reference (partial last tile)"

    print("KERNEL_OK")
</pallas_src>

<mosaic_0001>
module attributes {stable_mosaic.version = 11 : i64} {
  func.func @kernel(%arg0: i32, %arg1: memref<8x4xf32, #tpu.memory_space<vmem>>, %arg2: memref<128x128xbf16, #tpu.memory_space<vmem>>, %arg3: memref<1x128xf32, #tpu.memory_space<vmem>>, %arg4: memref<128x128xbf16, #tpu.memory_space<vmem>>, %arg5: memref<1x128xf32, #tpu.memory_space<vmem>>, %arg6: memref<128x128xbf16, #tpu.memory_space<vmem>>, %arg7: memref<1x128xf32, #tpu.memory_space<vmem>>, %arg8: memref<8x128xf32, #tpu.memory_space<vmem>>, %arg9: memref<8x128xbf16, #tpu.memory_space<vmem>>) attributes {dimension_semantics = [#tpu.dimension_semantics<parallel>], iteration_bounds = array<i64: 1>, scalar_prefetch = 0 : i64, scratch_operands = 1 : i64, tpu.core_type = #tpu.core_type<tc>, window_params = [{transform_indices = @transform_0, window_bounds = array<i64: 8, 4>}, {pipeline_mode = #tpu.pipeline_mode<synchronous>, transform_indices = @transform_1, window_bounds = array<i64: 128, 128>}, {pipeline_mode = #tpu.pipeline_mode<synchronous>, transform_indices = @transform_2, window_bounds = array<i64: 1, 128>}, {pipeline_mode = #tpu.pipeline_mode<synchronous>, transform_indices = @transform_3, window_bounds = array<i64: 128, 128>}, {pipeline_mode = #tpu.pipeline_mode<synchronous>, transform_indices = @transform_4, window_bounds = array<i64: 1, 128>}, {pipeline_mode = #tpu.pipeline_mode<synchronous>, transform_indices = @transform_5, window_bounds = array<i64: 128, 128>}, {pipeline_mode = #tpu.pipeline_mode<synchronous>, transform_indices = @transform_6, window_bounds = array<i64: 1, 128>}, {transform_indices = @transform_7, window_bounds = array<i64: 8, 128>}]} {
    %c0_i32 = arith.constant 0 : i32
    %0 = arith.cmpi eq, %arg0, %c0_i32 : i32
    %1 = arith.extui %0 : i1 to i32
    %c0_i32_0 = arith.constant 0 : i32
    %2 = arith.cmpi ne, %1, %c0_i32_0 : i32
    scf.if %2 {
      %cst_22 = arith.constant 0.000000e+00 : bf16
      %27 = vector.broadcast %cst_22 : bf16 to vector<8x128xbf16>
      %c0_23 = arith.constant 0 : index
      %c0_24 = arith.constant 0 : index
      %28 = vector.load %arg9[%c0_23, %c0_24] : memref<8x128xbf16, #tpu.memory_space<vmem>>, vector<8x128xbf16>
      tpu.vector_store %arg9[%c0_23, %c0_24], %27 {strides = array<i32>} : memref<8x128xbf16, #tpu.memory_space<vmem>>, vector<8x128xbf16>,
    } else {
    }
    %c0 = arith.constant 0 : index
    %c0_1 = arith.constant 0 : index
    %3 = vector.load %arg1[%c0, %c0_1] : memref<8x4xf32, #tpu.memory_space<vmem>>, vector<8x4xf32>
    %4 = arith.truncf %3 : vector<8x4xf32> to vector<8x4xbf16>
    %c0_2 = arith.constant 0 : index
    %c0_3 = arith.constant 0 : index
    %5 = vector.load %arg9[%c0_2, %c0_3] : memref<8x128xbf16, #tpu.memory_space<vmem>>, vector<8x4xbf16>
    tpu.vector_store %arg9[%c0_2, %c0_3], %4 {strides = array<i32>} : memref<8x128xbf16, #tpu.memory_space<vmem>>, vector<8x4xbf16>,
    %c0_4 = arith.constant 0 : index
    %c0_5 = arith.constant 0 : index
    %6 = vector.load %arg9[%c0_4, %c0_5] : memref<8x128xbf16, #tpu.memory_space<vmem>>, vector<8x128xbf16>
    %c0_6 = arith.constant 0 : index
    %c0_7 = arith.constant 0 : index
    %7 = vector.load %arg2[%c0_6, %c0_7] : memref<128x128xbf16, #tpu.memory_space<vmem>>, vector<128x128xbf16>
    %c0_8 = arith.constant 0 : index
    %c0_9 = arith.constant 0 : index
    %8 = vector.load %arg3[%c0_8, %c0_9] : memref<1x128xf32, #tpu.memory_space<vmem>>, vector<1x128xf32>
    %cst = arith.constant dense<0.000000e+00> : vector<8x128xf32>
    %9 = tpu.matmul %6, %7, %cst {dimension_numbers = #tpu.dot_dimension_numbers<[1], [0], [0], [1], [0, 0, 1, 1], [], []>} : vector<8x128xbf16>, vector<128x128xbf16>, vector<8x128xf32> -> vector<8x128xf32>
    %10 = vector.broadcast %8 : vector<1x128xf32> to vector<8x128xf32>
    %11 = arith.addf %9, %10 : vector<8x128xf32>
    %12 = math.tanh %11 : vector<8x128xf32>
    %13 = arith.truncf %12 : vector<8x128xf32> to vector<8x128xbf16>
    %c0_10 = arith.constant 0 : index
    %c0_11 = arith.constant 0 : index
    %14 = vector.load %arg4[%c0_10, %c0_11] : memref<128x128xbf16, #tpu.memory_space<vmem>>, vector<128x128xbf16>
    %c0_12 = arith.constant 0 : index
    %c0_13 = arith.constant 0 : index
    %15 = vector.load %arg5[%c0_12, %c0_13] : memref<1x128xf32, #tpu.memory_space<vmem>>, vector<1x128xf32>
    %cst_14 = arith.constant dense<0.000000e+00> : vector<8x128xf32>
    %16 = tpu.matmul %13, %14, %cst_14 {dimension_numbers = #tpu.dot_dimension_numbers<[1], [0], [0], [1], [0, 0, 1, 1], [], []>} : vector<8x128xbf16>, vector<128x128xbf16>, vector<8x128xf32> -> vector<8x128xf32>
    %17 = vector.broadcast %15 : vector<1x128xf32> to vector<8x128xf32>
    %18 = arith.addf %16, %17 : vector<8x128xf32>
    %19 = math.tanh %18 : vector<8x128xf32>
    %20 = arith.truncf %19 : vector<8x128xf32> to vector<8x128xbf16>
    %c0_15 = arith.constant 0 : index
    %c0_16 = arith.constant 0 : index
    %21 = vector.load %arg6[%c0_15, %c0_16] : memref<128x128xbf16, #tpu.memory_space<vmem>>, vector<128x128xbf16>
    %c0_17 = arith.constant 0 : index
    %c0_18 = arith.constant 0 : index
    %22 = vector.load %arg7[%c0_17, %c0_18] : memref<1x128xf32, #tpu.memory_space<vmem>>, vector<1x128xf32>
    %cst_19 = arith.constant dense<0.000000e+00> : vector<8x128xf32>
    %23 = tpu.matmul %20, %21, %cst_19 {dimension_numbers = #tpu.dot_dimension_numbers<[1], [0], [0], [1], [0, 0, 1, 1], [], []>} : vector<8x128xbf16>, vector<128x128xbf16>, vector<8x128xf32> -> vector<8x128xf32>
    %24 = vector.broadcast %22 : vector<1x128xf32> to vector<8x128xf32>
    %25 = arith.addf %23, %24 : vector<8x128xf32>
    %c0_20 = arith.constant 0 : index
    %c0_21 = arith.constant 0 : index
    %26 = vector.load %arg8[%c0_20, %c0_21] : memref<8x128xf32, #tpu.memory_space<vmem>>, vector<8x128xf32>
    tpu.vector_store %arg8[%c0_20, %c0_21], %25 {strides = array<i32>} : memref<8x128xf32, #tpu.memory_space<vmem>>, vector<8x128xf32>,
    return
  }
  func.func @transform_0(%arg0: i32) -> (i32, i32) {
    %c0_i32 = arith.constant 0 : i32
    %c0_i32_0 = arith.constant 0 : i32
    return %arg0, %c0_i32 : i32, i32
  }
  func.func @transform_1(%arg0: i32) -> (i32, i32) {
    %c0_i32 = arith.constant 0 : i32
    %c0_i32_0 = arith.constant 0 : i32
    %c0_i32_1 = arith.constant 0 : i32
    return %c0_i32, %c0_i32_0 : i32, i32
  }
  func.func @transform_2(%arg0: i32) -> (i32, i32) {
    %c0_i32 = arith.constant 0 : i32
    %c0_i32_0 = arith.constant 0 : i32
    %c0_i32_1 = arith.constant 0 : i32
    return %c0_i32, %c0_i32_0 : i32, i32
  }
  func.func @transform_3(%arg0: i32) -> (i32, i32) {
    %c0_i32 = arith.constant 0 : i32
    %c0_i32_0 = arith.constant 0 : i32
    %c0_i32_1 = arith.constant 0 : i32
    return %c0_i32, %c0_i32_0 : i32, i32
  }
  func.func @transform_4(%arg0: i32) -> (i32, i32) {
    %c0_i32 = arith.constant 0 : i32
    %c0_i32_0 = arith.constant 0 : i32
    %c0_i32_1 = arith.constant 0 : i32
    return %c0_i32, %c0_i32_0 : i32, i32
  }
  func.func @transform_5(%arg0: i32) -> (i32, i32) {
    %c0_i32 = arith.constant 0 : i32
    %c0_i32_0 = arith.constant 0 : i32
    %c0_i32_1 = arith.constant 0 : i32
    return %c0_i32, %c0_i32_0 : i32, i32
  }
  func.func @transform_6(%arg0: i32) -> (i32, i32) {
    %c0_i32 = arith.constant 0 : i32
    %c0_i32_0 = arith.constant 0 : i32
    %c0_i32_1 = arith.constant 0 : i32
    return %c0_i32, %c0_i32_0 : i32, i32
  }
  func.func @transform_7(%arg0: i32) -> (i32, i32) {
    %c0_i32 = arith.constant 0 : i32
    %c0_i32_0 = arith.constant 0 : i32
    return %arg0, %c0_i32 : i32, i32
  }
}

module attributes {stable_mosaic.version = 11 : i64} {
  func.func @kernel(%arg0: i32, %arg1: memref<8x4xf32, #tpu.memory_space<vmem>>, %arg2: memref<128x128xbf16, #tpu.memory_space<vmem>>, %arg3: memref<1x128xf32, #tpu.memory_space<vmem>>, %arg4: memref<128x128xbf16, #tpu.memory_space<vmem>>, %arg5: memref<1x128xf32, #tpu.memory_space<vmem>>, %arg6: memref<128x128xbf16, #tpu.memory_space<vmem>>, %arg7: memref<1x128xf32, #tpu.memory_space<vmem>>, %arg8: memref<8x128xf32, #tpu.memory_space<vmem>>, %arg9: memref<8x128xbf16, #tpu.memory_space<vmem>>) attributes {dimension_semantics = [#tpu.dimension_semantics<parallel>], iteration_bounds = array<i64: 1>, scalar_prefetch = 0 : i64, scratch_operands = 1 : i64, tpu.core_type = #tpu.core_type<tc>, window_params = [{transform_indices = @transform_0, window_bounds = array<i64: 8, 4>}, {pipeline_mode = #tpu.pipeline_mode<synchronous>, transform_indices = @transform_1, window_bounds = array<i64: 128, 128>}, {pipeline_mode = #tpu.pipeline_mode<synchronous>, transform_indices = @transform_2, window_bounds = array<i64: 1, 128>}, {pipeline_mode = #tpu.pipeline_mode<synchronous>, transform_indices = @transform_3, window_bounds = array<i64: 128, 128>}, {pipeline_mode = #tpu.pipeline_mode<synchronous>, transform_indices = @transform_4, window_bounds = array<i64: 1, 128>}, {pipeline_mode = #tpu.pipeline_mode<synchronous>, transform_indices = @transform_5, window_bounds = array<i64: 128, 128>}, {pipeline_mode = #tpu.pipeline_mode<synchronous>, transform_indices = @transform_6, window_bounds = array<i64: 1, 128>}, {transform_indices = @transform_7, window_bounds = array<i64: 8, 128>}]} {
    %c0_i32 = arith.constant 0 : i32
    %0 = arith.cmpi eq, %arg0, %c0_i32 : i32
    %1 = arith.extui %0 : i1 to i32
    %c0_i32_0 = arith.constant 0 : i32
    %2 = arith.cmpi ne, %1, %c0_i32_0 : i32
    scf.if %2 {
      %cst_22 = arith.constant 0.000000e+00 : bf16
      %27 = vector.broadcast %cst_22 : bf16 to vector<8x128xbf16>
      %c0_23 = arith.constant 0 : index
      %c0_24 = arith.constant 0 : index
      %28 = vector.load %arg9[%c0_23, %c0_24] : memref<8x128xbf16, #tpu.memory_space<vmem>>, vector<8x128xbf16>
      tpu.vector_store %arg9[%c0_23, %c0_24], %27 {strides = array<i32>} : memref<8x128xbf16, #tpu.memory_space<vmem>>, vector<8x128xbf16>,
    } else {
    }
    %c0 = arith.constant 0 : index
    %c0_1 = arith.constant 0 : index
    %3 = vector.load %arg1[%c0, %c0_1] : memref<8x4xf32, #tpu.memory_space<vmem>>, vector<8x4xf32>
    %4 = arith.truncf %3 : vector<8x4xf32> to vector<8x4xbf16>
    %c0_2 = arith.constant 0 : index
    %c0_3 = arith.constant 0 : index
    %5 = vector.load %arg9[%c0_2, %c0_3] : memref<8x128xbf16, #tpu.memory_space<vmem>>, vector<8x4xbf16>
    tpu.vector_store %arg9[%c0_2, %c0_3], %4 {strides = array<i32>} : memref<8x128xbf16, #tpu.memory_space<vmem>>, vector<8x4xbf16>,
    %c0_4 = arith.constant 0 : index
    %c0_5 = arith.constant 0 : index
    %6 = vector.load %arg9[%c0_4, %c0_5] : memref<8x128xbf16, #tpu.memory_space<vmem>>, vector<8x128xbf16>
    %c0_6 = arith.constant 0 : index
    %c0_7 = arith.constant 0 : index
    %7 = vector.load %arg2[%c0_6, %c0_7] : memref<128x128xbf16, #tpu.memory_space<vmem>>, vector<128x128xbf16>
    %c0_8 = arith.constant 0 : index
    %c0_9 = arith.constant 0 : index
    %8 = vector.load %arg3[%c0_8, %c0_9] : memref<1x128xf32, #tpu.memory_space<vmem>>, vector<1x128xf32>
    %cst = arith.constant dense<0.000000e+00> : vector<8x128xf32>
    %9 = tpu.matmul %6, %7, %cst {dimension_numbers = #tpu.dot_dimension_numbers<[1], [0], [0], [1], [0, 0, 1, 1], [], []>} : vector<8x128xbf16>, vector<128x128xbf16>, vector<8x128xf32> -> vector<8x128xf32>
    %10 = vector.broadcast %8 : vector<1x128xf32> to vector<8x128xf32>
    %11 = arith.addf %9, %10 : vector<8x128xf32>
    %12 = math.tanh %11 : vector<8x128xf32>
    %13 = arith.truncf %12 : vector<8x128xf32> to vector<8x128xbf16>
    %c0_10 = arith.constant 0 : index
    %c0_11 = arith.constant 0 : index
    %14 = vector.load %arg4[%c0_10, %c0_11] : memref<128x128xbf16, #tpu.memory_space<vmem>>, vector<128x128xbf16>
    %c0_12 = arith.constant 0 : index
    %c0_13 = arith.constant 0 : index
    %15 = vector.load %arg5[%c0_12, %c0_13] : memref<1x128xf32, #tpu.memory_space<vmem>>, vector<1x128xf32>
    %cst_14 = arith.constant dense<0.000000e+00> : vector<8x128xf32>
    %16 = tpu.matmul %13, %14, %cst_14 {dimension_numbers = #tpu.dot_dimension_numbers<[1], [0], [0], [1], [0, 0, 1, 1], [], []>} : vector<8x128xbf16>, vector<128x128xbf16>, vector<8x128xf32> -> vector<8x128xf32>
    %17 = vector.broadcast %15 : vector<1x128xf32> to vector<8x128xf32>
    %18 = arith.addf %16, %17 : vector<8x128xf32>
    %19 = math.tanh %18 : vector<8x128xf32>
    %20 = arith.truncf %19 : vector<8x128xf32> to vector<8x128xbf16>
    %c0_15 = arith.constant 0 : index
    %c0_16 = arith.constant 0 : index
    %21 = vector.load %arg6[%c0_15, %c0_16] : memref<128x128xbf16, #tpu.memory_space<vmem>>, vector<128x128xbf16>
    %c0_17 = arith.constant 0 : index
    %c0_18 = arith.constant 0 : index
    %22 = vector.load %arg7[%c0_17, %c0_18] : memref<1x128xf32, #tpu.memory_space<vmem>>, vector<1x128xf32>
    %cst_19 = arith.constant dense<0.000000e+00> : vector<8x128xf32>
    %23 = tpu.matmul %20, %21, %cst_19 {dimension_numbers = #tpu.dot_dimension_numbers<[1], [0], [0], [1], [0, 0, 1, 1], [], []>} : vector<8x128xbf16>, vector<128x128xbf16>, vector<8x128xf32> -> vector<8x128xf32>
    %24 = vector.broadcast %22 : vector<1x128xf32> to vector<8x128xf32>
    %25 = arith.addf %23, %24 : vector<8x128xf32>
    %c0_20 = arith.constant 0 : index
    %c0_21 = arith.constant 0 : index
    %26 = vector.load %arg8[%c0_20, %c0_21] : memref<8x128xf32, #tpu.memory_space<vmem>>, vector<8x128xf32>
    tpu.vector_store %arg8[%c0_20, %c0_21], %25 {strides = array<i32>} : memref<8x128xf32, #tpu.memory_space<vmem>>, vector<8x128xf32>,
    return
  }
  func.func @transform_0(%arg0: i32) -> (i32, i32) {
    %c0_i32 = arith.constant 0 : i32
    %c0_i32_0 = arith.constant 0 : i32
    return %arg0, %c0_i32 : i32, i32
  }
  func.func @transform_1(%arg0: i32) -> (i32, i32) {
    %c0_i32 = arith.constant 0 : i32
    %c0_i32_0 = arith.constant 0 : i32
    %c0_i32_1 = arith.constant 0 : i32
    return %c0_i32, %c0_i32_0 : i32, i32
  }
  func.func @transform_2(%arg0: i32) -> (i32, i32) {
    %c0_i32 = arith.constant 0 : i32
    %c0_i32_0 = arith.constant 0 : i32
    %c0_i32_1 = arith.constant 0 : i32
    return %c0_i32, %c0_i32_0 : i32, i32
  }
  func.func @transform_3(%arg0: i32) -> (i32, i32) {
    %c0_i32 = arith.constant 0 : i32
    %c0_i32_0 = arith.constant 0 : i32
    %c0_i32_1 = arith.constant 0 : i32
    return %c0_i32, %c0_i32_0 : i32, i32
  }
  func.func @transform_4(%arg0: i32) -> (i32, i32) {
    %c0_i32 = arith.constant 0 : i32
    %c0_i32_0 = arith.constant 0 : i32
    %c0_i32_1 = arith.constant 0 : i32
    return %c0_i32, %c0_i32_0 : i32, i32
  }
  func.func @transform_5(%arg0: i32) -> (i32, i32) {
    %c0_i32 = arith.constant 0 : i32
    %c0_i32_0 = arith.constant 0 : i32
    %c0_i32_1 = arith.constant 0 : i32
    return %c0_i32, %c0_i32_0 : i32, i32
  }
  func.func @transform_6(%arg0: i32) -> (i32, i32) {
    %c0_i32 = arith.constant 0 : i32
    %c0_i32_0 = arith.constant 0 : i32
    %c0_i32_1 = arith.constant 0 : i32
    return %c0_i32, %c0_i32_0 : i32, i32
  }
  func.func @transform_7(%arg0: i32) -> (i32, i32) {
    %c0_i32 = arith.constant 0 : i32
    %c0_i32_0 = arith.constant 0 : i32
    return %arg0, %c0_i32 : i32, i32
  }
}

</mosaic_0001>

<bundles_post_ra>
// kernel: tpu_custom_call.1
= control target key start
LH: loop header
LB: loop body
LE: loop exit
PB: predicated region body
PF: predicated region fallthrough
CT: control target
= control target key end

     0   :  { %12 = vsyncpa [#allocation4], 0  ;;  %s833_s0 = inlined_call_operand.vmem [shape: f32[8,4], index: 0, kind: input, shape index: {}]   ;;  %s834_s1 = inlined_call_operand.hbm [shape: bf16[128,128], index: 1, kind: input, shape index: {}]   ;;  %s835_s2 = inlined_call_operand.vmem [shape: f32[1,128], index: 2, kind: input, shape index: {}]   ;;  %s836_s3 = inlined_call_operand.hbm [shape: bf16[128,128], index: 3, kind: input, shape index: {}]   ;;  %s837_s4 = inlined_call_operand.vmem [shape: f32[1,128], index: 4, kind: input, shape index: {}]   ;;  %s838_s5 = inlined_call_operand.hbm [shape: bf16[128,128], index: 5, kind: input, shape index: {}]   ;;  %s839_s6 = inlined_call_operand.vmem [shape: f32[1,128], index: 6, kind: input, shape index: {}]   ;;  %s840_s7 = inlined_call_operand.hbm [shape: f32[8,128], index: 7, kind: output, shape index: {}]  }
   0x1   :  { %13 = vsyncpa [#allocation7], 0 }
   0x2   :  { %14 = vsyncpa [#allocation5], 0  ;;  %s678_s24 = smov [#allocation6]   ;;  %s679_s26 = smov [#allocation3]  }
   0x3   :  { %s36_s25 = sshll.u32 %s678_s24, 4  ;;  %s22_s27 = sshll.u32 %s679_s26, 4  ;;  %s37_s25 = int_to_ptr.vmem [resolvable:$true] %s36_s25  ;;  %s727_s27 = int_to_ptr.vmem [resolvable:$true] %s22_s27 }
   0x4   :  { %s584_s30 = scalar_lea.hbm %s836_s3, 1024 }
   0x5   :  { %p585_p0 = scmp.ne.s32.totalorder %s836_s3, %s584_s30  ;;  %p588_p1 = scmp.lt.u32.totalorder %s584_s30, %s836_s3 }
   0x7   :  { %p590_p2 = pnand %p588_p1, %p585_p0 }
   0x9   :  { %593 = shalt.err (!%p590_p2)
}
   0xa   :  { %s594_s12 = scalar_lea.vmem %s37_s25, 1024  ;;  %p599_p4 = scmp.lt.s32.totalorder %s37_s25, %s37_s25 }
   0xb   :  { %p595_p3 = scmp.ne.s32.totalorder %s37_s25, %s594_s12  ;;  %p600_p5 = scmp.lt.s32.totalorder %s594_s12, %s594_s12 }
   0xd   :  { %p601_p6 = por %p600_p5, %p599_p4 }
   0xf   :  { %p602_p7 = pnand %p601_p6, %p595_p3 }
  0x11   :  { %605 = shalt.err (!%p602_p7)
}
  0x12   :  { %s680_s13 = smov 64   ;;  %s681_s14 = smov 4  }
  0x13   :  { %42 = dma.hbm_to_vmem [thread:$0]  %s836_s3, 1024, %s37_s25, [#allocation7], %s680_s13, %s680_s13, %s681_s14  }
  0x14   :  { %s606_s19 = scalar_lea.hbm %s834_s1, 1024 }
  0x15   :  { %p607_p8 = scmp.ne.s32.totalorder %s834_s1, %s606_s19  ;;  %p610_p9 = scmp.lt.u32.totalorder %s606_s19, %s834_s1 }
  0x17   :  { %p612_p10 = pnand %p610_p9, %p607_p8 }
  0x19   :  { %615 = shalt.err (!%p612_p10)
}
  0x1a   :  { %s616_s24 = scalar_lea.vmem %s727_s27, 1024  ;;  %p621_p12 = scmp.lt.s32.totalorder %s727_s27, %s727_s27 }
  0x1b   :  { %p617_p11 = scmp.ne.s32.totalorder %s727_s27, %s616_s24  ;;  %p622_p13 = scmp.lt.s32.totalorder %s616_s24, %s616_s24 }
  0x1d   :  { %p623_p0 = por %p622_p13, %p621_p12 }
  0x1f   :  { %p624_p1 = pnand %p623_p0, %p617_p11 }
  0x21   :  { %627 = shalt.err (!%p624_p1)
}
  0x22   :  { %28 = dma.hbm_to_vmem [thread:$0]  %s834_s1, 1024, %s727_s27, [#allocation4], %s680_s13, %s680_s13, %s681_s14  }
  0x23   :  { %s682_s26 = smov [#allocation8]   ;;  %s628_s8 = scalar_lea.hbm %s838_s5, 1024 }
  0x24   :  { %s50_s28 = sshll.u32 %s682_s26, 4  ;;  %p629_p2 = scmp.ne.s32.totalorder %s838_s5, %s628_s8  ;;  %s51_s28 = int_to_ptr.vmem [resolvable:$true] %s50_s28 }
  0x25   :  { %p632_p3 = scmp.lt.u32.totalorder %s628_s8, %s838_s5 }
  0x27   :  { %p634_p4 = pnand %p632_p3, %p629_p2 }
  0x29   :  { %637 = shalt.err (!%p634_p4)
}
  0x2a   :  { %s638_s15 = scalar_lea.vmem %s51_s28, 1024  ;;  %p643_p6 = scmp.lt.s32.totalorder %s51_s28, %s51_s28 }
  0x2b   :  { %p639_p5 = scmp.ne.s32.totalorder %s51_s28, %s638_s15  ;;  %p644_p7 = scmp.lt.s32.totalorder %s638_s15, %s638_s15 }
  0x2d   :  { %p645_p8 = por %p644_p7, %p643_p6 }
  0x2f   :  { %p646_p9 = pnand %p645_p8, %p639_p5 }
  0x31   :  { %649 = shalt.err (!%p646_p9)
}
  0x32   :  { %56 = dma.hbm_to_vmem [thread:$0]  %s838_s5, 1024, %s51_s28, [#allocation7], %s680_s13, %s680_s13, %s681_s14  }
  0x33   :  { %672 = dma.done.wait [#allocation4], 1024  }
  0x34   :  { %673 = vsyncadd [#allocation4], 4294966272 }
  0x35   :  { %674 = dma.done.wait [#allocation7], 2048  }
  0x36   :  { %675 = vsyncadd [#allocation7], 4294965248  ;;  %v683_v0 = vmov 0.0   ;;  %vm684_vm0 = vmmov 0   ;;  %v685_v1 = vmov 0   ;;  %v556_v2 = vld [vmem:[#allocation3] sm:$0xff]  }
  0x37   :  { %487 = vmatprep.subr.bf16.mxu0 %v683_v0  ;;  %503 = vmatprep.mubr.msk.bf16.mxu0 %vm684_vm0, %v683_v0  ;;  %73 = vst [vmem:[#allocation2] sm:$0xf] %v685_v1  ;;  %v557_v3 = vld [vmem:[#allocation3 + $0x8] sm:$0xff]   ;;  %v558_v4 = vld [vmem:[#allocation3 + $0x10] sm:$0xff]   ;;  %v74_v5 = vld [vmem:[%s833_s0] sm:$0xff]  ;;  %vm76_vm1 = vcmask 27648  }
  0x38   :  { %507 = vmatprep.subr.bf16.mxu1 %v683_v0  ;;  %523 = vmatprep.mubr.msk.bf16.mxu1 %vm684_vm0, %v683_v0  ;;  %v75_v6 = vpack.c.bf16 %v74_v5, %v74_v5  ;;  %v564_v7 = vld [vmem:[#allocation6] sm:$0xff]   ;;  %v559_v8 = vld [vmem:[#allocation3 + $0x18] sm:$0xff]   ;;  %v565_v9 = vld [vmem:[#allocation6 + $0x8] sm:$0xff]   ;;  %s686_s19 = smov [#allocation9]  }
  0x39   :  { %488 = vmatpush3.bf16.msra.mxu0 %v556_v2  ;;  %508 = vmatpush3.bf16.msra.mxu1 %v564_v7  ;;  %v560_v10 = vld [vmem:[#allocation3 + $0x20] sm:$0xff]   ;;  %v566_v11 = vld [vmem:[#allocation6 + $0x10] sm:$0xff]   ;;  %v561_v12 = vld [vmem:[#allocation3 + $0x28] sm:$0xff]   ;;  %s423_s20 = sshll.u32 %s686_s19, 4  ;;  %s424_s20 = int_to_ptr.vmem [resolvable:$true] %s423_s20 }
  0x3a   :  { %489 = vmatprep.subr.bf16.mxu0 %v683_v0  ;;  %77 = vst.msk [vmem:[#allocation2] sm:$0xf] %vm76_vm1, %v75_v6  ;;  %509 = vmatprep.subr.bf16.mxu1 %v683_v0  ;;  %v567_v13 = vld [vmem:[#allocation6 + $0x18] sm:$0xff]   ;;  %v562_v14 = vld [vmem:[#allocation3 + $0x30] sm:$0xff]   ;;  %v568_v17 = vld [vmem:[#allocation6 + $0x20] sm:$0xff]   ;;  %p655_p11 = scmp.lt.s32.totalorder %s424_s20, %s424_s20 }
  0x3b   :  { %v563_v15 = vld [vmem:[#allocation3 + $0x38] sm:$0xff]   ;;  %v569_v18 = vld [vmem:[#allocation6 + $0x28] sm:$0xff]   ;;  %v570_v19 = vld [vmem:[#allocation6 + $0x30] sm:$0xff]  }
  0x3c   :  { %v571_v20 = vld [vmem:[#allocation6 + $0x38] sm:$0xff]   ;;  %v572_v21 = vld [vmem:[#allocation8] sm:$0xff]   ;;  %v573_v22 = vld [vmem:[#allocation8 + $0x8] sm:$0xff]  }
  0x3d   :  { %490 = vmatpush3.bf16.msra.mxu0 %v557_v3  ;;  %510 = vmatpush3.bf16.msra.mxu1 %v565_v9  ;;  %v574_v23 = vld [vmem:[#allocation8 + $0x10] sm:$0xff]   ;;  %v575_v24 = vld [vmem:[#allocation8 + $0x18] sm:$0xff]   ;;  %v576_v33 = vld [vmem:[#allocation8 + $0x20] sm:$0xff]  }
  0x3e   :  { %491 = vmatprep.subr.bf16.mxu0 %v683_v0  ;;  %511 = vmatprep.subr.bf16.mxu1 %v683_v0  ;;  %v433_v25 = vld [vmem:[%s835_s2] ss:$0 sm:$0xff]  ;;  %v577_v34 = vld [vmem:[#allocation8 + $0x28] sm:$0xff]   ;;  %v578_v35 = vld [vmem:[#allocation8 + $0x30] sm:$0xff]  }
  0x3f   :  { %v579_v36 = vld [vmem:[#allocation8 + $0x38] sm:$0xff]  }
  0x40   :  { %v442_v37 = vld [vmem:[%s837_s4] ss:$0 sm:$0xff]  ;;  %s650_s4 = scalar_lea.vmem %s424_s20, 128 }
  0x41   :  { %492 = vmatpush3.bf16.msra.mxu0 %v558_v4  ;;  %512 = vmatpush3.bf16.msra.mxu1 %v566_v11  ;;  %v78_v16 = vld [vmem:[#allocation2] sm:$0xf]  ;;  %p651_p10 = scmp.ne.s32.totalorder %s424_s20, %s650_s4  ;;  %p656_p12 = scmp.lt.s32.totalorder %s650_s4, %s650_s4 }
  0x42   :  { %493 = vmatprep.subr.bf16.mxu0 %v683_v0  ;;  %513 = vmatprep.subr.bf16.mxu1 %v683_v0  ;;  %v451_v45 = vld [vmem:[%s839_s6] ss:$0 sm:$0xff] }
  0x43   :  { %p657_p13 = por %p656_p12, %p655_p11 }
  0x45   :  { %494 = vmatpush3.bf16.msra.mxu0 %v559_v8  ;;  %514 = vmatpush3.bf16.msra.mxu1 %v567_v13  ;;  %p658_p0 = pnand %p657_p13, %p651_p10 }
  0x46   :  { %495 = vmatprep.subr.bf16.mxu0 %v683_v0  ;;  %515 = vmatprep.subr.bf16.mxu1 %v683_v0 }
  0x49   :  { %496 = vmatpush3.bf16.msra.mxu0 %v560_v10  ;;  %516 = vmatpush3.bf16.msra.mxu1 %v568_v17 }
  0x4a   :  { %497 = vmatprep.subr.bf16.mxu0 %v683_v0  ;;  %517 = vmatprep.subr.bf16.mxu1 %v683_v0 }
  0x4d   :  { %498 = vmatpush3.bf16.msra.mxu0 %v561_v12  ;;  %518 = vmatpush3.bf16.msra.mxu1 %v569_v18 }
  0x4e   :  { %499 = vmatprep.subr.bf16.mxu0 %v683_v0  ;;  %519 = vmatprep.subr.bf16.mxu1 %v683_v0 }
  0x51   :  { %500 = vmatpush3.bf16.msra.mxu0 %v562_v14  ;;  %520 = vmatpush3.bf16.msra.mxu1 %v570_v19 }
  0x52   :  { %501 = vmatprep.subr.bf16.mxu0 %v683_v0  ;;  %521 = vmatprep.subr.bf16.mxu1 %v683_v0 }
  0x55   :  { %502 = vmatpush3.bf16.msra.mxu0 %v563_v15  ;;  %522 = vmatpush3.bf16.msra.mxu1 %v571_v20 }
  0x56   :  { %527 = vmatprep.subr.bf16.mxu0 %v683_v0 }
  0x58   :  { %504 = vmatmul.mubr.bf16.vlgmr.msra.gmra.mrb[0].mxu0 %v78_v16 }
  0x59   :  { %543 = vmatprep.mubr.msk.bf16.mxu0 %vm684_vm0, %v683_v0  ;;  %528 = vmatpush3.bf16.msra.mxu0 %v572_v21 }
  0x5a   :  { %529 = vmatprep.subr.bf16.mxu0 %v683_v0 }
  0x5d   :  { %530 = vmatpush3.bf16.msra.mxu0 %v573_v22 }
  0x5e   :  { %531 = vmatprep.subr.bf16.mxu0 %v683_v0 }
  0x61   :  { %532 = vmatpush3.bf16.msra.mxu0 %v574_v23 }
  0x62   :  { %533 = vmatprep.subr.bf16.mxu0 %v683_v0 }
  0x65   :  { %534 = vmatpush3.bf16.msra.mxu0 %v575_v24 }
  0x66   :  { %535 = vmatprep.subr.bf16.mxu0 %v683_v0 }
  0x69   :  { %536 = vmatpush3.bf16.msra.mxu0 %v576_v33 }
  0x6a   :  { %537 = vmatprep.subr.bf16.mxu0 %v683_v0 }
  0x6d   :  { %538 = vmatpush3.bf16.msra.mxu0 %v577_v34 }
  0x6e   :  { %539 = vmatprep.subr.bf16.mxu0 %v683_v0 }
  0x71   :  { %540 = vmatpush3.bf16.msra.mxu0 %v578_v35 }
  0x72   :  { %541 = vmatprep.subr.bf16.mxu0 %v683_v0 }
  0x75   :  { %542 = vmatpush3.bf16.msra.mxu0 %v579_v36 }
 0x12b   :  { %v184_v26 = vpop.f32.mrb[0].mxu0 }
 0x12c   :  { %v185_v27 = vadd.f32 %v433_v25, %v184_v26  ;;  %v505_v28 = vpop.f32.mrb[1].mxu0 }
 0x12d   :  { %v187_v29 = vpop.f32.mrb[2].mxu0 }
 0x12e   :  { %580 = vtanh.f32 %v185_v27  ;;  %v506_v30 = vpop.f32.mrb[3].mxu0 }
 0x138   :  { %v581_v31 = vpop.eup %580 }
 0x139   :  { %v191_v32 = vpack.c.bf16 %v581_v31, %v581_v31 }
 0x13b   :  { %524 = vmatmul.mubr.bf16.vlgmr.msra.gmra.mrb[0].mxu1 %v191_v32 }
 0x20e   :  { %v297_v38 = vpop.f32.mrb[0].mxu1 }
 0x20f   :  { %v298_v39 = vadd.f32 %v442_v37, %v297_v38  ;;  %v525_v40 = vpop.f32.mrb[1].mxu1 }
 0x210   :  { %v300_v41 = vpop.f32.mrb[2].mxu1 }
 0x211   :  { %582 = vtanh.f32 %v298_v39  ;;  %v526_v42 = vpop.f32.mrb[3].mxu1 }
 0x21b   :  { %v583_v43 = vpop.eup %582 }
 0x21c   :  { %v304_v44 = vpack.c.bf16 %v583_v43, %v583_v43 }
 0x21e   :  { %544 = vmatmul.mubr.bf16.vlgmr.msra.gmra.mrb[4].mxu0 %v304_v44 }
 0x2f1   :  { %v410_v46 = vpop.f32.mrb[4].mxu0 }
 0x2f2   :  { %v411_v47 = vadd.f32 %v451_v45, %v410_v46  ;;  %v545_v48 = vpop.f32.mrb[5].mxu0 }
 0x2f3   :  { %v413_v49 = vpop.f32.mrb[6].mxu0 }
 0x2f4   :  { %416 = vst [vmem:[#allocation9] sm:$0xff] %v411_v47  ;;  %v546_v50 = vpop.f32.mrb[7].mxu0 }
 0x2f5   :  { %661 = shalt.err (!%p658_p0)
}
 0x2f6   :  { %s662_s6 = scalar_lea.hbm %s840_s7, 128 }
 0x2f7   :  { %p663_p1 = scmp.ne.s32.totalorder %s840_s7, %s662_s6  ;;  %p666_p2 = scmp.lt.u32.totalorder %s662_s6, %s840_s7 }
 0x2f9   :  { %p668_p3 = pnand %p666_p2, %p663_p1 }
 0x2fb   :  { %671 = shalt.err (!%p668_p3)
}
 0x2fc   :  { %426 = dma.vmem_to_hbm [thread:$0]  %s424_s20, 128, %s840_s7, [#allocation5]  }
 0x2fd   :  { %676 = dma.done.wait [#allocation5], 128  }
 0x2fe   :  { %677 = vsyncadd [#allocation5], 4294967168 }
 0x2ff   :  { %430 = vsyncpa [#allocation4], 1 }
 0x300   :  { %431 = vsyncpa [#allocation7], 1 }
 0x301   :  { %432 = vsyncpa [#allocation5], 1 }

// kernel: tpu_custom_call.1
= control target key start
LH: loop header
LB: loop body
LE: loop exit
PB: predicated region body
PF: predicated region fallthrough
CT: control target
= control target key end

     0   :  { %12 = vsyncpa [#allocation4], 0  ;;  %s833_s0 = inlined_call_operand.vmem [shape: f32[8,4], index: 0, kind: input, shape index: {}]   ;;  %s834_s1 = inlined_call_operand.hbm [shape: bf16[128,128], index: 1, kind: input, shape index: {}]   ;;  %s835_s2 = inlined_call_operand.vmem [shape: f32[1,128], index: 2, kind: input, shape index: {}]   ;;  %s836_s3 = inlined_call_operand.hbm [shape: bf16[128,128], index: 3, kind: input, shape index: {}]   ;;  %s837_s4 = inlined_call_operand.vmem [shape: f32[1,128], index: 4, kind: input, shape index: {}]   ;;  %s838_s5 = inlined_call_operand.hbm [shape: bf16[128,128], index: 5, kind: input, shape index: {}]   ;;  %s839_s6 = inlined_call_operand.vmem [shape: f32[1,128], index: 6, kind: input, shape index: {}]   ;;  %s840_s7 = inlined_call_operand.hbm [shape: f32[8,128], index: 7, kind: output, shape index: {}]  }
   0x1   :  { %13 = vsyncpa [#allocation7], 0 }
   0x2   :  { %14 = vsyncpa [#allocation5], 0  ;;  %s678_s24 = smov [#allocation6]   ;;  %s679_s26 = smov [#allocation3]  }
   0x3   :  { %s36_s25 = sshll.u32 %s678_s24, 4  ;;  %s22_s27 = sshll.u32 %s679_s26, 4  ;;  %s37_s25 = int_to_ptr.vmem [resolvable:$true] %s36_s25  ;;  %s727_s27 = int_to_ptr.vmem [resolvable:$true] %s22_s27 }
   0x4   :  { %s584_s30 = scalar_lea.hbm %s836_s3, 1024 }
   0x5   :  { %p585_p0 = scmp.ne.s32.totalorder %s836_s3, %s584_s30  ;;  %p588_p1 = scmp.lt.u32.totalorder %s584_s30, %s836_s3 }
   0x7   :  { %p590_p2 = pnand %p588_p1, %p585_p0 }
   0x9   :  { %593 = shalt.err (!%p590_p2)
}
   0xa   :  { %s594_s12 = scalar_lea.vmem %s37_s25, 1024  ;;  %p599_p4 = scmp.lt.s32.totalorder %s37_s25, %s37_s25 }
   0xb   :  { %p595_p3 = scmp.ne.s32.totalorder %s37_s25, %s594_s12  ;;  %p600_p5 = scmp.lt.s32.totalorder %s594_s12, %s594_s12 }
   0xd   :  { %p601_p6 = por %p600_p5, %p599_p4 }
   0xf   :  { %p602_p7 = pnand %p601_p6, %p595_p3 }
  0x11   :  { %605 = shalt.err (!%p602_p7)
}
  0x12   :  { %s680_s13 = smov 64   ;;  %s681_s14 = smov 4  }
  0x13   :  { %42 = dma.hbm_to_vmem [thread:$0]  %s836_s3, 1024, %s37_s25, [#allocation7], %s680_s13, %s680_s13, %s681_s14  }
  0x14   :  { %s606_s19 = scalar_lea.hbm %s834_s1, 1024 }
  0x15   :  { %p607_p8 = scmp.ne.s32.totalorder %s834_s1, %s606_s19  ;;  %p610_p9 = scmp.lt.u32.totalorder %s606_s19, %s834_s1 }
  0x17   :  { %p612_p10 = pnand %p610_p9, %p607_p8 }
  0x19   :  { %615 = shalt.err (!%p612_p10)
}
  0x1a   :  { %s616_s24 = scalar_lea.vmem %s727_s27, 1024  ;;  %p621_p12 = scmp.lt.s32.totalorder %s727_s27, %s727_s27 }
  0x1b   :  { %p617_p11 = scmp.ne.s32.totalorder %s727_s27, %s616_s24  ;;  %p622_p13 = scmp.lt.s32.totalorder %s616_s24, %s616_s24 }
  0x1d   :  { %p623_p0 = por %p622_p13, %p621_p12 }
  0x1f   :  { %p624_p1 = pnand %p623_p0, %p617_p11 }
  0x21   :  { %627 = shalt.err (!%p624_p1)
}
  0x22   :  { %28 = dma.hbm_to_vmem [thread:$0]  %s834_s1, 1024, %s727_s27, [#allocation4], %s680_s13, %s680_s13, %s681_s14  }
  0x23   :  { %s682_s26 = smov [#allocation8]   ;;  %s628_s8 = scalar_lea.hbm %s838_s5, 1024 }
  0x24   :  { %s50_s28 = sshll.u32 %s682_s26, 4  ;;  %p629_p2 = scmp.ne.s32.totalorder %s838_s5, %s628_s8  ;;  %s51_s28 = int_to_ptr.vmem [resolvable:$true] %s50_s28 }
  0x25   :  { %p632_p3 = scmp.lt.u32.totalorder %s628_s8, %s838_s5 }
  0x27   :  { %p634_p4 = pnand %p632_p3, %p629_p2 }
  0x29   :  { %637 = shalt.err (!%p634_p4)
}
  0x2a   :  { %s638_s15 = scalar_lea.vmem %s51_s28, 1024  ;;  %p643_p6 = scmp.lt.s32.totalorder %s51_s28, %s51_s28 }
  0x2b   :  { %p639_p5 = scmp.ne.s32.totalorder %s51_s28, %s638_s15  ;;  %p644_p7 = scmp.lt.s32.totalorder %s638_s15, %s638_s15 }
  0x2d   :  { %p645_p8 = por %p644_p7, %p643_p6 }
  0x2f   :  { %p646_p9 = pnand %p645_p8, %p639_p5 }
  0x31   :  { %649 = shalt.err (!%p646_p9)
}
  0x32   :  { %56 = dma.hbm_to_vmem [thread:$0]  %s838_s5, 1024, %s51_s28, [#allocation7], %s680_s13, %s680_s13, %s681_s14  }
  0x33   :  { %672 = dma.done.wait [#allocation4], 1024  }
  0x34   :  { %673 = vsyncadd [#allocation4], 4294966272 }
  0x35   :  { %674 = dma.done.wait [#allocation7], 2048  }
  0x36   :  { %675 = vsyncadd [#allocation7], 4294965248  ;;  %v683_v0 = vmov 0.0   ;;  %vm684_vm0 = vmmov 0   ;;  %v685_v1 = vmov 0   ;;  %v556_v2 = vld [vmem:[#allocation3] sm:$0xff]  }
  0x37   :  { %487 = vmatprep.subr.bf16.mxu0 %v683_v0  ;;  %503 = vmatprep.mubr.msk.bf16.mxu0 %vm684_vm0, %v683_v0  ;;  %73 = vst [vmem:[#allocation2] sm:$0xf] %v685_v1  ;;  %v557_v3 = vld [vmem:[#allocation3 + $0x8] sm:$0xff]   ;;  %v558_v4 = vld [vmem:[#allocation3 + $0x10] sm:$0xff]   ;;  %v74_v5 = vld [vmem:[%s833_s0] sm:$0xff]  ;;  %vm76_vm1 = vcmask 27648  }
  0x38   :  { %507 = vmatprep.subr.bf16.mxu1 %v683_v0  ;;  %523 = vmatprep.mubr.msk.bf16.mxu1 %vm684_vm0, %v683_v0  ;;  %v75_v6 = vpack.c.bf16 %v74_v5, %v74_v5  ;;  %v564_v7 = vld [vmem:[#allocation6] sm:$0xff]   ;;  %v559_v8 = vld [vmem:[#allocation3 + $0x18] sm:$0xff]   ;;  %v565_v9 = vld [vmem:[#allocation6 + $0x8] sm:$0xff]   ;;  %s686_s19 = smov [#allocation9]  }
  0x39   :  { %488 = vmatpush3.bf16.msra.mxu0 %v556_v2  ;;  %508 = vmatpush3.bf16.msra.mxu1 %v564_v7  ;;  %v560_v10 = vld [vmem:[#allocation3 + $0x20] sm:$0xff]   ;;  %v566_v11 = vld [vmem:[#allocation6 + $0x10] sm:$0xff]   ;;  %v561_v12 = vld [vmem:[#allocation3 + $0x28] sm:$0xff]   ;;  %s423_s20 = sshll.u32 %s686_s19, 4  ;;  %s424_s20 = int_to_ptr.vmem [resolvable:$true] %s423_s20 }
  0x3a   :  { %489 = vmatprep.subr.bf16.mxu0 %v683_v0  ;;  %77 = vst.msk [vmem:[#allocation2] sm:$0xf] %vm76_vm1, %v75_v6  ;;  %509 = vmatprep.subr.bf16.mxu1 %v683_v0  ;;  %v567_v13 = vld [vmem:[#allocation6 + $0x18] sm:$0xff]   ;;  %v562_v14 = vld [vmem:[#allocation3 + $0x30] sm:$0xff]   ;;  %v568_v17 = vld [vmem:[#allocation6 + $0x20] sm:$0xff]   ;;  %p655_p11 = scmp.lt.s32.totalorder %s424_s20, %s424_s20 }
  0x3b   :  { %v563_v15 = vld [vmem:[#allocation3 + $0x38] sm:$0xff]   ;;  %v569_v18 = vld [vmem:[#allocation6 + $0x28] sm:$0xff]   ;;  %v570_v19 = vld [vmem:[#allocation6 + $0x30] sm:$0xff]  }
  0x3c   :  { %v571_v20 = vld [vmem:[#allocation6 + $0x38] sm:$0xff]   ;;  %v572_v21 = vld [vmem:[#allocation8] sm:$0xff]   ;;  %v573_v22 = vld [vmem:[#allocation8 + $0x8] sm:$0xff]  }
  0x3d   :  { %490 = vmatpush3.bf16.msra.mxu0 %v557_v3  ;;  %510 = vmatpush3.bf16.msra.mxu1 %v565_v9  ;;  %v574_v23 = vld [vmem:[#allocation8 + $0x10] sm:$0xff]   ;;  %v575_v24 = vld [vmem:[#allocation8 + $0x18] sm:$0xff]   ;;  %v576_v33 = vld [vmem:[#allocation8 + $0x20] sm:$0xff]  }
  0x3e   :  { %491 = vmatprep.subr.bf16.mxu0 %v683_v0  ;;  %511 = vmatprep.subr.bf16.mxu1 %v683_v0  ;;  %v433_v25 = vld [vmem:[%s835_s2] ss:$0 sm:$0xff]  ;;  %v577_v34 = vld [vmem:[#allocation8 + $0x28] sm:$0xff]   ;;  %v578_v35 = vld [vmem:[#allocation8 + $0x30] sm:$0xff]  }
  0x3f   :  { %v579_v36 = vld [vmem:[#allocation8 + $0x38] sm:$0xff]  }
  0x40   :  { %v442_v37 = vld [vmem:[%s837_s4] ss:$0 sm:$0xff]  ;;  %s650_s4 = scalar_lea.vmem %s424_s20, 128 }
  0x41   :  { %492 = vmatpush3.bf16.msra.mxu0 %v558_v4  ;;  %512 = vmatpush3.bf16.msra.mxu1 %v566_v11  ;;  %v78_v16 = vld [vmem:[#allocation2] sm:$0xf]  ;;  %p651_p10 = scmp.ne.s32.totalorder %s424_s20, %s650_s4  ;;  %p656_p12 = scmp.lt.s32.totalorder %s650_s4, %s650_s4 }
  0x42   :  { %493 = vmatprep.subr.bf16.mxu0 %v683_v0  ;;  %513 = vmatprep.subr.bf16.mxu1 %v683_v0  ;;  %v451_v45 = vld [vmem:[%s839_s6] ss:$0 sm:$0xff] }
  0x43   :  { %p657_p13 = por %p656_p12, %p655_p11 }
  0x45   :  { %494 = vmatpush3.bf16.msra.mxu0 %v559_v8  ;;  %514 = vmatpush3.bf16.msra.mxu1 %v567_v13  ;;  %p658_p0 = pnand %p657_p13, %p651_p10 }
  0x46   :  { %495 = vmatprep.subr.bf16.mxu0 %v683_v0  ;;  %515 = vmatprep.subr.bf16.mxu1 %v683_v0 }
  0x49   :  { %496 = vmatpush3.bf16.msra.mxu0 %v560_v10  ;;  %516 = vmatpush3.bf16.msra.mxu1 %v568_v17 }
  0x4a   :  { %497 = vmatprep.subr.bf16.mxu0 %v683_v0  ;;  %517 = vmatprep.subr.bf16.mxu1 %v683_v0 }
  0x4d   :  { %498 = vmatpush3.bf16.msra.mxu0 %v561_v12  ;;  %518 = vmatpush3.bf16.msra.mxu1 %v569_v18 }
  0x4e   :  { %499 = vmatprep.subr.bf16.mxu0 %v683_v0  ;;  %519 = vmatprep.subr.bf16.mxu1 %v683_v0 }
  0x51   :  { %500 = vmatpush3.bf16.msra.mxu0 %v562_v14  ;;  %520 = vmatpush3.bf16.msra.mxu1 %v570_v19 }
  0x52   :  { %501 = vmatprep.subr.bf16.mxu0 %v683_v0  ;;  %521 = vmatprep.subr.bf16.mxu1 %v683_v0 }
  0x55   :  { %502 = vmatpush3.bf16.msra.mxu0 %v563_v15  ;;  %522 = vmatpush3.bf16.msra.mxu1 %v571_v20 }
  0x56   :  { %527 = vmatprep.subr.bf16.mxu0 %v683_v0 }
  0x58   :  { %504 = vmatmul.mubr.bf16.vlgmr.msra.gmra.mrb[0].mxu0 %v78_v16 }
  0x59   :  { %543 = vmatprep.mubr.msk.bf16.mxu0 %vm684_vm0, %v683_v0  ;;  %528 = vmatpush3.bf16.msra.mxu0 %v572_v21 }
  0x5a   :  { %529 = vmatprep.subr.bf16.mxu0 %v683_v0 }
  0x5d   :  { %530 = vmatpush3.bf16.msra.mxu0 %v573_v22 }
  0x5e   :  { %531 = vmatprep.subr.bf16.mxu0 %v683_v0 }
  0x61   :  { %532 = vmatpush3.bf16.msra.mxu0 %v574_v23 }
  0x62   :  { %533 = vmatprep.subr.bf16.mxu0 %v683_v0 }
  0x65   :  { %534 = vmatpush3.bf16.msra.mxu0 %v575_v24 }
  0x66   :  { %535 = vmatprep.subr.bf16.mxu0 %v683_v0 }
  0x69   :  { %536 = vmatpush3.bf16.msra.mxu0 %v576_v33 }
  0x6a   :  { %537 = vmatprep.subr.bf16.mxu0 %v683_v0 }
  0x6d   :  { %538 = vmatpush3.bf16.msra.mxu0 %v577_v34 }
  0x6e   :  { %539 = vmatprep.subr.bf16.mxu0 %v683_v0 }
  0x71   :  { %540 = vmatpush3.bf16.msra.mxu0 %v578_v35 }
  0x72   :  { %541 = vmatprep.subr.bf16.mxu0 %v683_v0 }
  0x75   :  { %542 = vmatpush3.bf16.msra.mxu0 %v579_v36 }
 0x12b   :  { %v184_v26 = vpop.f32.mrb[0].mxu0 }
 0x12c   :  { %v185_v27 = vadd.f32 %v433_v25, %v184_v26  ;;  %v505_v28 = vpop.f32.mrb[1].mxu0 }
 0x12d   :  { %v187_v29 = vpop.f32.mrb[2].mxu0 }
 0x12e   :  { %580 = vtanh.f32 %v185_v27  ;;  %v506_v30 = vpop.f32.mrb[3].mxu0 }
 0x138   :  { %v581_v31 = vpop.eup %580 }
 0x139   :  { %v191_v32 = vpack.c.bf16 %v581_v31, %v581_v31 }
 0x13b   :  { %524 = vmatmul.mubr.bf16.vlgmr.msra.gmra.mrb[0].mxu1 %v191_v32 }
 0x20e   :  { %v297_v38 = vpop.f32.mrb[0].mxu1 }
 0x20f   :  { %v298_v39 = vadd.f32 %v442_v37, %v297_v38  ;;  %v525_v40 = vpop.f32.mrb[1].mxu1 }
 0x210   :  { %v300_v41 = vpop.f32.mrb[2].mxu1 }
 0x211   :  { %582 = vtanh.f32 %v298_v39  ;;  %v526_v42 = vpop.f32.mrb[3].mxu1 }
 0x21b   :  { %v583_v43 = vpop.eup %582 }
 0x21c   :  { %v304_v44 = vpack.c.bf16 %v583_v43, %v583_v43 }
 0x21e   :  { %544 = vmatmul.mubr.bf16.vlgmr.msra.gmra.mrb[4].mxu0 %v304_v44 }
 0x2f1   :  { %v410_v46 = vpop.f32.mrb[4].mxu0 }
 0x2f2   :  { %v411_v47 = vadd.f32 %v451_v45, %v410_v46  ;;  %v545_v48 = vpop.f32.mrb[5].mxu0 }
 0x2f3   :  { %v413_v49 = vpop.f32.mrb[6].mxu0 }
 0x2f4   :  { %416 = vst [vmem:[#allocation9] sm:$0xff] %v411_v47  ;;  %v546_v50 = vpop.f32.mrb[7].mxu0 }
 0x2f5   :  { %661 = shalt.err (!%p658_p0)
}
 0x2f6   :  { %s662_s6 = scalar_lea.hbm %s840_s7, 128 }
 0x2f7   :  { %p663_p1 = scmp.ne.s32.totalorder %s840_s7, %s662_s6  ;;  %p666_p2 = scmp.lt.u32.totalorder %s662_s6, %s840_s7 }
 0x2f9   :  { %p668_p3 = pnand %p666_p2, %p663_p1 }
 0x2fb   :  { %671 = shalt.err (!%p668_p3)
}
 0x2fc   :  { %426 = dma.vmem_to_hbm [thread:$0]  %s424_s20, 128, %s840_s7, [#allocation5]  }
 0x2fd   :  { %676 = dma.done.wait [#allocation5], 128  }
 0x2fe   :  { %677 = vsyncadd [#allocation5], 4294967168 }
 0x2ff   :  { %430 = vsyncpa [#allocation4], 1 }
 0x300   :  { %431 = vsyncpa [#allocation7], 1 }
 0x301   :  { %432 = vsyncpa [#allocation5], 1 }

</bundles_post_ra>
